<compile_context>
chip_gen: v7x
topology: tpu7x:2x2x1
jax: 0.10.0
libtpu: 0.0.40
codegen_flags: <defaults>
</compile_context>

<pallas_src>
import functools

import jax
import jax.numpy as jnp
from jax.experimental import pallas as pl
from jax.experimental.pallas import tpu as pltpu

_LANE = 128
_SUBLANE = 8
_BN_EPS = 1e-5
_MAX_TILE_B = 512


def _round_up(x, m):
    return (x + m - 1) // m * m


def _cdiv(a, b):
    return (a + b - 1) // b


def _vmem_cap_bytes():
    """Physical VMEM of the current generation (conservative fallback)."""
    try:
        info = pltpu.get_tpu_info()
        cap = getattr(info, "vmem_capacity_bytes", None)
        if cap:
            return int(cap)
    except Exception:
        pass
    return 64 * 1024 * 1024  # v7x per-TensorCore VMEM (smallest of the fleet)


def _const_block_spec(shape, single_buffer):
    """BlockSpec for a grid-invariant (never re-fetched) block."""
    n = len(shape)
    idx = lambda i: (0,) * n
    if single_buffer:
        try:
            return pl.BlockSpec(shape, idx, pipeline_mode=pl.Buffered(1))
        except Exception:  # older jax without pipeline_mode kwarg
            return pl.BlockSpec(shape, idx)
    return pl.BlockSpec(shape, idx)


# ----------------------------- fused kernel --------------------------------

def _fused_mlp_kernel(x_ref, *refs, num_layers, batch_norm):
    """Runs the whole Linear(+BN)+ReLU stack on one batch tile.

    x_ref           : (TILE_B, Pin_0)    mxu_dtype  input tile (zero-padded lanes)
    refs[l]         : (Pin_l, Pout_l)    mxu_dtype  weight of layer l, [in, out]
    refs[L + l]     : (8, Pout_l)        f32        row0=bias, row1=gamma, row2=beta
    refs[2L]        : (TILE_B, Pout_L-1) f32        output tile
    """
    w_refs = refs[:num_layers]
    aux_refs = refs[num_layers:2 * num_layers]
    o_ref = refs[2 * num_layers]

    h = x_ref[...]                                   # mxu_dtype (bf16 by default)
    for l in range(num_layers):                      # static unroll, L is tiny
        w = w_refs[l][...]
        y = jnp.dot(h, w, preferred_element_type=jnp.float32)   # MXU, f32 acc
        aux = aux_refs[l][...]                       # (8, Pout), f32
        y = y + aux[0:1, :]                          # bias (f32 epilogue)
        if batch_norm:
            # Training-mode BatchNorm1d over the (full) batch dimension,
            # centered two-pass variance (no E[y^2]-mean^2 cancellation).
            mean = jnp.mean(y, axis=0, keepdims=True)
            cen = y - mean
            var = jnp.mean(cen * cen, axis=0, keepdims=True)
            y = cen * jax.lax.rsqrt(var + _BN_EPS)
            y = y * aux[1:2, :] + aux[2:3, :]        # gamma, beta
        y = jnp.maximum(y, 0.0)                      # ReLU
        # Carry activations in mxu_dtype between layers (the next matmul casts
        # anyway); only the final layer keeps f32 for the output store.
        h = y.astype(w.dtype) if l + 1 < num_layers else y
    o_ref[...] = h.astype(o_ref.dtype)


# ------------------------------- wrapper ------------------------------------

class LinearNetPallas:
    """JAX/Pallas port of utils.nn.model.ParticleNetPyGJittable.LinearNet."""

    def __init__(self, layers, input_size=0, output_size=0, batch_norm=False, *,
                 key, mxu_dtype=jnp.bfloat16):
        layers = list(layers)
        if input_size:
            layers.insert(0, input_size)
        if output_size:
            layers.append(output_size)
        self.sizes = layers
        self.batch_norm = batch_norm
        self.num_layers = len(layers) - 1
        self.in_features = layers[0]
        self.out_features = layers[-1]
        self.mxu_dtype = mxu_dtype

        # Per-layer lane-dense padded widths (no global max-width padding);
        # padded weight rows/cols and padded bias/gamma/beta are zero so the
        # padded lanes stay exactly zero through every layer.
        self.pad_sizes = [_round_up(d, _LANE) for d in layers]

        w_list, aux_list = [], []
        for i in range(self.num_layers):
            fan_in, fan_out = layers[i], layers[i + 1]
            p_in, p_out = self.pad_sizes[i], self.pad_sizes[i + 1]
            key, kw, kb = jax.random.split(key, 3)
            bound = 1.0 / (fan_in ** 0.5)            # PyTorch nn.Linear init
            w = jax.random.uniform(kw, (fan_in, fan_out), jnp.float32, -bound, bound)
            b = jax.random.uniform(kb, (fan_out,), jnp.float32, -bound, bound)
            w_pad = jnp.zeros((p_in, p_out), jnp.float32).at[:fan_in, :fan_out].set(w)
            aux = jnp.zeros((_SUBLANE, p_out), jnp.float32)
            aux = aux.at[0, :fan_out].set(b)
            if batch_norm:
                aux = aux.at[1, :fan_out].set(1.0)   # gamma (beta row stays 0)
            w_list.append(w_pad.astype(mxu_dtype))   # bf16 MXU operands by default
            aux_list.append(aux)
        self.w_list = w_list
        self.aux_list = aux_list

    # --- tiling choice -------------------------------------------------------
    def _choose_tile_b(self, B):
        # Minimal number of <= 512-row tiles, each rounded up to 8 sublanes.
        n_tiles = max(1, _cdiv(B, _MAX_TILE_B))
        tile_b = _round_up(_cdiv(B, n_tiles), _SUBLANE)
        # v7x megacore: if the grid would collapse to one step but the tile is
        # big enough to amortize per-step overhead, split it in two so
        # ("parallel",) actually uses both TensorCores. Harmless on v5e/v6e.
        if n_tiles == 1 and tile_b >= 256:
            tile_b = _round_up(_cdiv(tile_b, 2), _SUBLANE)
        return tile_b

    def __call__(self, x):
        B, f_in = x.shape
        assert f_in == self.in_features
        L = self.num_layers
        p_in0 = self.pad_sizes[0]
        p_out = self.pad_sizes[-1]

        if self.batch_norm:
            # BN statistics must see the whole batch -> single batch block.
            # TODO(synk): chunked in-kernel BN stats (streaming sub-tiles) for
            # very large batches are not implemented.
            tile_b, b_pad = B, B
            semantics = ("arbitrary",)
        else:
            tile_b = self._choose_tile_b(B)
            b_pad = _round_up(B, tile_b)
            semantics = ("parallel",)

        # Feed the kernel bf16 (mxu_dtype) input: halves the input DMA since
        # the first matmul casts to mxu_dtype anyway.
        x_pad = jnp.pad(x.astype(self.mxu_dtype),
                        ((0, b_pad - B), (0, p_in0 - f_in)))

        kernel = functools.partial(_fused_mlp_kernel,
                                   num_layers=L, batch_norm=self.batch_norm)

        w_bytes = sum(w.nbytes for w in self.w_list)
        aux_bytes = sum(a.nbytes for a in self.aux_list)
        flops = sum(2 * b_pad * self.pad_sizes[i] * self.pad_sizes[i + 1]
                    for i in range(L))
        cost = pl.CostEstimate(
            flops=flops,
            transcendentals=(sum(self.pad_sizes[1:]) if self.batch_norm else 0),
            bytes_accessed=x_pad.nbytes + b_pad * p_out * 4 + w_bytes + aux_bytes)

        out_shape = jax.ShapeDtypeStruct((b_pad, p_out), jnp.float32)

        def run(single_buffer):
            itm = jnp.dtype(self.mxu_dtype).itemsize
            # VMEM budget from the actual tile sizes (double-buffered activation
            # tiles + weights/aux + in-kernel f32 temporaries + slack).
            needed = (2 * tile_b * p_in0 * itm                       # x tile x2
                      + 2 * tile_b * p_out * 4                       # out tile x2
                      + (1 if single_buffer else 2) * (w_bytes + aux_bytes)
                      + 3 * tile_b * max(self.pad_sizes) * 4         # f32 temps
                      + 4 * 1024 * 1024)                             # slack
            vmem_limit = int(min(max(needed, 32 * 1024 * 1024),
                                 _vmem_cap_bytes() * 3 // 4))

            in_specs = ([pl.BlockSpec((tile_b, p_in0), lambda i: (i, 0))]
                        + [_const_block_spec(w.shape, single_buffer)
                           for w in self.w_list]
                        + [_const_block_spec(a.shape, single_buffer)
                           for a in self.aux_list])

            fn = pl.pallas_call(
                kernel,
                out_shape=out_shape,
                grid=(b_pad // tile_b,),
                in_specs=in_specs,
                out_specs=pl.BlockSpec((tile_b, p_out), lambda i: (i, 0)),
                compiler_params=pltpu.CompilerParams(
                    dimension_semantics=semantics,
                    vmem_limit_bytes=vmem_limit),
                cost_estimate=cost,
            )
            return fn(x_pad, *self.w_list, *self.aux_list)

        try:
            out = jax.block_until_ready(run(single_buffer=True))
        except Exception:
            # pl.Buffered(1) not supported on this jax build -> default buffering.
            out = run(single_buffer=False)
        return out[:B, :self.out_features]

    # TODO(synk): BatchNorm1d running_mean/running_var momentum updates and
    # eval-mode (stored-stat) inference are not implemented; training-mode
    # batch statistics only.


# ------------------------------- reference ----------------------------------

def _reference(x, net):
    """Pure-JAX reference mirroring the kernel math exactly (mxu_dtype matmul
    operands + carried activations, f32 accumulation/epilogue, training-mode
    centered batch-norm statistics)."""
    L = net.num_layers
    h = x.astype(net.mxu_dtype)
    for l in range(L):
        fi, fo = net.sizes[l], net.sizes[l + 1]
        w = net.w_list[l][:fi, :fo]
        y = jnp.dot(h, w, preferred_element_type=jnp.float32)
        y = y + net.aux_list[l][0, :fo]
        if net.batch_norm:
            mean = jnp.mean(y, axis=0, keepdims=True)
            var = jnp.mean((y - mean) ** 2, axis=0, keepdims=True)
            y = (y - mean) * jax.lax.rsqrt(var + _BN_EPS)
            y = y * net.aux_list[l][1, :fo] + net.aux_list[l][2, :fo]
        y = jnp.maximum(y, 0.0)
        h = y.astype(net.mxu_dtype) if l + 1 < L else y
    return h


if __name__ == "__main__":
    key = jax.random.PRNGKey(0)
    k_x, k_x2, k_net, k_net_bn, k_net_f32 = jax.random.split(key, 5)

    layers = [16, 32, 32, 8]            # [input_size, ...hidden..., output_size]
    batch = 8
    x = jax.random.normal(k_x, (batch, layers[0]), jnp.float32)

    # --- no batch norm (module default), small batch -------------------------
    net = LinearNetPallas(layers, batch_norm=False, key=k_net)
    out = jax.block_until_ready(net(x))
    ref = _reference(x, net)
    assert out.shape == (batch, layers[-1])
    assert jnp.allclose(out, ref, atol=5e-3, rtol=5e-3), \
        float(jnp.max(jnp.abs(out - ref)))

    # --- no batch norm, larger batch exercising the adaptive batch grid ------
    big = 600                            # -> 2 tiles of 304 rows (608 padded)
    x_big = jax.random.normal(k_x2, (big, layers[0]), jnp.float32)
    out_big = jax.block_until_ready(net(x_big))
    ref_big = _reference(x_big, net)
    assert out_big.shape == (big, layers[-1])
    assert jnp.allclose(out_big, ref_big, atol=5e-3, rtol=5e-3), \
        float(jnp.max(jnp.abs(out_big - ref_big)))

    # --- batch norm path (training-mode batch statistics) --------------------
    net_bn = LinearNetPallas(layers, batch_norm=True, key=k_net_bn)
    out_bn = jax.block_until_ready(net_bn(x))
    ref_bn = _reference(x, net_bn)
    assert out_bn.shape == (batch, layers[-1])
    assert jnp.allclose(out_bn, ref_bn, atol=5e-3, rtol=5e-3), \
        float(jnp.max(jnp.abs(out_bn - ref_bn)))

    # --- f32 MXU escape hatch (faithful to PyTorch's f32 nn.Linear) ----------
    net_f32 = LinearNetPallas(layers, batch_norm=False, key=k_net_f32,
                              mxu_dtype=jnp.float32)
    out_f32 = jax.block_until_ready(net_f32(x))
    ref_f32 = _reference(x, net_f32)
    assert jnp.allclose(out_f32, ref_f32, atol=5e-3, rtol=5e-3), \
        float(jnp.max(jnp.abs(out_f32 - ref_f32)))

    print("KERNEL_OK")
</pallas_src>

<mosaic_0001>
module attributes {stable_mosaic.version = 11 : i64} {
  func.func @_fused_mlp_kernel(%arg0: i32, %arg1: memref<8x128xbf16, #tpu.memory_space<vmem>>, %arg2: memref<128x128xbf16, #tpu.memory_space<vmem>>, %arg3: memref<128x128xbf16, #tpu.memory_space<vmem>>, %arg4: memref<128x128xbf16, #tpu.memory_space<vmem>>, %arg5: memref<8x128xf32, #tpu.memory_space<vmem>>, %arg6: memref<8x128xf32, #tpu.memory_space<vmem>>, %arg7: memref<8x128xf32, #tpu.memory_space<vmem>>, %arg8: memref<8x128xf32, #tpu.memory_space<vmem>>) attributes {dimension_semantics = [#tpu.dimension_semantics<parallel>], iteration_bounds = array<i64: 1>, scalar_prefetch = 0 : i64, scratch_operands = 0 : i64, tpu.core_type = #tpu.core_type<tc>, window_params = [{transform_indices = @transform_0, window_bounds = array<i64: 8, 128>}, {pipeline_mode = #tpu.pipeline_mode<synchronous>, transform_indices = @transform_1, window_bounds = array<i64: 128, 128>}, {pipeline_mode = #tpu.pipeline_mode<synchronous>, transform_indices = @transform_2, window_bounds = array<i64: 128, 128>}, {pipeline_mode = #tpu.pipeline_mode<synchronous>, transform_indices = @transform_3, window_bounds = array<i64: 128, 128>}, {pipeline_mode = #tpu.pipeline_mode<synchronous>, transform_indices = @transform_4, window_bounds = array<i64: 8, 128>}, {pipeline_mode = #tpu.pipeline_mode<synchronous>, transform_indices = @transform_5, window_bounds = array<i64: 8, 128>}, {pipeline_mode = #tpu.pipeline_mode<synchronous>, transform_indices = @transform_6, window_bounds = array<i64: 8, 128>}, {transform_indices = @transform_7, window_bounds = array<i64: 8, 128>}]} {
    %c0 = arith.constant 0 : index
    %c0_0 = arith.constant 0 : index
    %0 = vector.load %arg1[%c0, %c0_0] : memref<8x128xbf16, #tpu.memory_space<vmem>>, vector<8x128xbf16>
    %c0_1 = arith.constant 0 : index
    %c0_2 = arith.constant 0 : index
    %1 = vector.load %arg2[%c0_1, %c0_2] : memref<128x128xbf16, #tpu.memory_space<vmem>>, vector<128x128xbf16>
    %cst = arith.constant dense<0.000000e+00> : vector<8x128xf32>
    %2 = tpu.matmul %0, %1, %cst {dimension_numbers = #tpu.dot_dimension_numbers<[1], [0], [0], [1], [0, 0, 1, 1], [], []>} : vector<8x128xbf16>, vector<128x128xbf16>, vector<8x128xf32> -> vector<8x128xf32>
    %c0_3 = arith.constant 0 : index
    %c0_4 = arith.constant 0 : index
    %3 = vector.load %arg5[%c0_3, %c0_4] : memref<8x128xf32, #tpu.memory_space<vmem>>, vector<8x128xf32>
    %4 = vector.extract_strided_slice %3 {offsets = [0, 0], sizes = [1, 128], strides = [1, 1]} : vector<8x128xf32> to vector<1x128xf32>
    %5 = vector.broadcast %4 : vector<1x128xf32> to vector<8x128xf32>
    %6 = arith.addf %2, %5 : vector<8x128xf32>
    %cst_5 = arith.constant 0.000000e+00 : f32
    %7 = vector.broadcast %cst_5 : f32 to vector<8x128xf32>
    %8 = arith.maximumf %6, %7 : vector<8x128xf32>
    %9 = arith.truncf %8 : vector<8x128xf32> to vector<8x128xbf16>
    %c0_6 = arith.constant 0 : index
    %c0_7 = arith.constant 0 : index
    %10 = vector.load %arg3[%c0_6, %c0_7] : memref<128x128xbf16, #tpu.memory_space<vmem>>, vector<128x128xbf16>
    %cst_8 = arith.constant dense<0.000000e+00> : vector<8x128xf32>
    %11 = tpu.matmul %9, %10, %cst_8 {dimension_numbers = #tpu.dot_dimension_numbers<[1], [0], [0], [1], [0, 0, 1, 1], [], []>} : vector<8x128xbf16>, vector<128x128xbf16>, vector<8x128xf32> -> vector<8x128xf32>
    %c0_9 = arith.constant 0 : index
    %c0_10 = arith.constant 0 : index
    %12 = vector.load %arg6[%c0_9, %c0_10] : memref<8x128xf32, #tpu.memory_space<vmem>>, vector<8x128xf32>
    %13 = vector.extract_strided_slice %12 {offsets = [0, 0], sizes = [1, 128], strides = [1, 1]} : vector<8x128xf32> to vector<1x128xf32>
    %14 = vector.broadcast %13 : vector<1x128xf32> to vector<8x128xf32>
    %15 = arith.addf %11, %14 : vector<8x128xf32>
    %cst_11 = arith.constant 0.000000e+00 : f32
    %16 = vector.broadcast %cst_11 : f32 to vector<8x128xf32>
    %17 = arith.maximumf %15, %16 : vector<8x128xf32>
    %18 = arith.truncf %17 : vector<8x128xf32> to vector<8x128xbf16>
    %c0_12 = arith.constant 0 : index
    %c0_13 = arith.constant 0 : index
    %19 = vector.load %arg4[%c0_12, %c0_13] : memref<128x128xbf16, #tpu.memory_space<vmem>>, vector<128x128xbf16>
    %cst_14 = arith.constant dense<0.000000e+00> : vector<8x128xf32>
    %20 = tpu.matmul %18, %19, %cst_14 {dimension_numbers = #tpu.dot_dimension_numbers<[1], [0], [0], [1], [0, 0, 1, 1], [], []>} : vector<8x128xbf16>, vector<128x128xbf16>, vector<8x128xf32> -> vector<8x128xf32>
    %c0_15 = arith.constant 0 : index
    %c0_16 = arith.constant 0 : index
    %21 = vector.load %arg7[%c0_15, %c0_16] : memref<8x128xf32, #tpu.memory_space<vmem>>, vector<8x128xf32>
    %22 = vector.extract_strided_slice %21 {offsets = [0, 0], sizes = [1, 128], strides = [1, 1]} : vector<8x128xf32> to vector<1x128xf32>
    %23 = vector.broadcast %22 : vector<1x128xf32> to vector<8x128xf32>
    %24 = arith.addf %20, %23 : vector<8x128xf32>
    %cst_17 = arith.constant 0.000000e+00 : f32
    %25 = vector.broadcast %cst_17 : f32 to vector<8x128xf32>
    %26 = arith.maximumf %24, %25 : vector<8x128xf32>
    %c0_18 = arith.constant 0 : index
    %c0_19 = arith.constant 0 : index
    %27 = vector.load %arg8[%c0_18, %c0_19] : memref<8x128xf32, #tpu.memory_space<vmem>>, vector<8x128xf32>
    tpu.vector_store %arg8[%c0_18, %c0_19], %26 {strides = array<i32>} : memref<8x128xf32, #tpu.memory_space<vmem>>, vector<8x128xf32>,
    return
  }
  func.func @transform_0(%arg0: i32) -> (i32, i32) {
    %c0_i32 = arith.constant 0 : i32
    %c0_i32_0 = arith.constant 0 : i32
    return %arg0, %c0_i32 : i32, i32
  }
  func.func @transform_1(%arg0: i32) -> (i32, i32) {
    %c0_i32 = arith.constant 0 : i32
    %c0_i32_0 = arith.constant 0 : i32
    %c0_i32_1 = arith.constant 0 : i32
    return %c0_i32, %c0_i32_0 : i32, i32
  }
  func.func @transform_2(%arg0: i32) -> (i32, i32) {
    %c0_i32 = arith.constant 0 : i32
    %c0_i32_0 = arith.constant 0 : i32
    %c0_i32_1 = arith.constant 0 : i32
    return %c0_i32, %c0_i32_0 : i32, i32
  }
  func.func @transform_3(%arg0: i32) -> (i32, i32) {
    %c0_i32 = arith.constant 0 : i32
    %c0_i32_0 = arith.constant 0 : i32
    %c0_i32_1 = arith.constant 0 : i32
    return %c0_i32, %c0_i32_0 : i32, i32
  }
  func.func @transform_4(%arg0: i32) -> (i32, i32) {
    %c0_i32 = arith.constant 0 : i32
    %c0_i32_0 = arith.constant 0 : i32
    %c0_i32_1 = arith.constant 0 : i32
    return %c0_i32, %c0_i32_0 : i32, i32
  }
  func.func @transform_5(%arg0: i32) -> (i32, i32) {
    %c0_i32 = arith.constant 0 : i32
    %c0_i32_0 = arith.constant 0 : i32
    %c0_i32_1 = arith.constant 0 : i32
    return %c0_i32, %c0_i32_0 : i32, i32
  }
  func.func @transform_6(%arg0: i32) -> (i32, i32) {
    %c0_i32 = arith.constant 0 : i32
    %c0_i32_0 = arith.constant 0 : i32
    %c0_i32_1 = arith.constant 0 : i32
    return %c0_i32, %c0_i32_0 : i32, i32
  }
  func.func @transform_7(%arg0: i32) -> (i32, i32) {
    %c0_i32 = arith.constant 0 : i32
    %c0_i32_0 = arith.constant 0 : i32
    return %arg0, %c0_i32 : i32, i32
  }
}

module attributes {stable_mosaic.version = 11 : i64} {
  func.func @_fused_mlp_kernel(%arg0: i32, %arg1: memref<8x128xbf16, #tpu.memory_space<vmem>>, %arg2: memref<128x128xbf16, #tpu.memory_space<vmem>>, %arg3: memref<128x128xbf16, #tpu.memory_space<vmem>>, %arg4: memref<128x128xbf16, #tpu.memory_space<vmem>>, %arg5: memref<8x128xf32, #tpu.memory_space<vmem>>, %arg6: memref<8x128xf32, #tpu.memory_space<vmem>>, %arg7: memref<8x128xf32, #tpu.memory_space<vmem>>, %arg8: memref<8x128xf32, #tpu.memory_space<vmem>>) attributes {dimension_semantics = [#tpu.dimension_semantics<parallel>], iteration_bounds = array<i64: 1>, scalar_prefetch = 0 : i64, scratch_operands = 0 : i64, tpu.core_type = #tpu.core_type<tc>, window_params = [{transform_indices = @transform_0, window_bounds = array<i64: 8, 128>}, {pipeline_mode = #tpu.pipeline_mode<synchronous>, transform_indices = @transform_1, window_bounds = array<i64: 128, 128>}, {pipeline_mode = #tpu.pipeline_mode<synchronous>, transform_indices = @transform_2, window_bounds = array<i64: 128, 128>}, {pipeline_mode = #tpu.pipeline_mode<synchronous>, transform_indices = @transform_3, window_bounds = array<i64: 128, 128>}, {pipeline_mode = #tpu.pipeline_mode<synchronous>, transform_indices = @transform_4, window_bounds = array<i64: 8, 128>}, {pipeline_mode = #tpu.pipeline_mode<synchronous>, transform_indices = @transform_5, window_bounds = array<i64: 8, 128>}, {pipeline_mode = #tpu.pipeline_mode<synchronous>, transform_indices = @transform_6, window_bounds = array<i64: 8, 128>}, {transform_indices = @transform_7, window_bounds = array<i64: 8, 128>}]} {
    %c0 = arith.constant 0 : index
    %c0_0 = arith.constant 0 : index
    %0 = vector.load %arg1[%c0, %c0_0] : memref<8x128xbf16, #tpu.memory_space<vmem>>, vector<8x128xbf16>
    %c0_1 = arith.constant 0 : index
    %c0_2 = arith.constant 0 : index
    %1 = vector.load %arg2[%c0_1, %c0_2] : memref<128x128xbf16, #tpu.memory_space<vmem>>, vector<128x128xbf16>
    %cst = arith.constant dense<0.000000e+00> : vector<8x128xf32>
    %2 = tpu.matmul %0, %1, %cst {dimension_numbers = #tpu.dot_dimension_numbers<[1], [0], [0], [1], [0, 0, 1, 1], [], []>} : vector<8x128xbf16>, vector<128x128xbf16>, vector<8x128xf32> -> vector<8x128xf32>
    %c0_3 = arith.constant 0 : index
    %c0_4 = arith.constant 0 : index
    %3 = vector.load %arg5[%c0_3, %c0_4] : memref<8x128xf32, #tpu.memory_space<vmem>>, vector<8x128xf32>
    %4 = vector.extract_strided_slice %3 {offsets = [0, 0], sizes = [1, 128], strides = [1, 1]} : vector<8x128xf32> to vector<1x128xf32>
    %5 = vector.broadcast %4 : vector<1x128xf32> to vector<8x128xf32>
    %6 = arith.addf %2, %5 : vector<8x128xf32>
    %cst_5 = arith.constant 0.000000e+00 : f32
    %7 = vector.broadcast %cst_5 : f32 to vector<8x128xf32>
    %8 = arith.maximumf %6, %7 : vector<8x128xf32>
    %9 = arith.truncf %8 : vector<8x128xf32> to vector<8x128xbf16>
    %c0_6 = arith.constant 0 : index
    %c0_7 = arith.constant 0 : index
    %10 = vector.load %arg3[%c0_6, %c0_7] : memref<128x128xbf16, #tpu.memory_space<vmem>>, vector<128x128xbf16>
    %cst_8 = arith.constant dense<0.000000e+00> : vector<8x128xf32>
    %11 = tpu.matmul %9, %10, %cst_8 {dimension_numbers = #tpu.dot_dimension_numbers<[1], [0], [0], [1], [0, 0, 1, 1], [], []>} : vector<8x128xbf16>, vector<128x128xbf16>, vector<8x128xf32> -> vector<8x128xf32>
    %c0_9 = arith.constant 0 : index
    %c0_10 = arith.constant 0 : index
    %12 = vector.load %arg6[%c0_9, %c0_10] : memref<8x128xf32, #tpu.memory_space<vmem>>, vector<8x128xf32>
    %13 = vector.extract_strided_slice %12 {offsets = [0, 0], sizes = [1, 128], strides = [1, 1]} : vector<8x128xf32> to vector<1x128xf32>
    %14 = vector.broadcast %13 : vector<1x128xf32> to vector<8x128xf32>
    %15 = arith.addf %11, %14 : vector<8x128xf32>
    %cst_11 = arith.constant 0.000000e+00 : f32
    %16 = vector.broadcast %cst_11 : f32 to vector<8x128xf32>
    %17 = arith.maximumf %15, %16 : vector<8x128xf32>
    %18 = arith.truncf %17 : vector<8x128xf32> to vector<8x128xbf16>
    %c0_12 = arith.constant 0 : index
    %c0_13 = arith.constant 0 : index
    %19 = vector.load %arg4[%c0_12, %c0_13] : memref<128x128xbf16, #tpu.memory_space<vmem>>, vector<128x128xbf16>
    %cst_14 = arith.constant dense<0.000000e+00> : vector<8x128xf32>
    %20 = tpu.matmul %18, %19, %cst_14 {dimension_numbers = #tpu.dot_dimension_numbers<[1], [0], [0], [1], [0, 0, 1, 1], [], []>} : vector<8x128xbf16>, vector<128x128xbf16>, vector<8x128xf32> -> vector<8x128xf32>
    %c0_15 = arith.constant 0 : index
    %c0_16 = arith.constant 0 : index
    %21 = vector.load %arg7[%c0_15, %c0_16] : memref<8x128xf32, #tpu.memory_space<vmem>>, vector<8x128xf32>
    %22 = vector.extract_strided_slice %21 {offsets = [0, 0], sizes = [1, 128], strides = [1, 1]} : vector<8x128xf32> to vector<1x128xf32>
    %23 = vector.broadcast %22 : vector<1x128xf32> to vector<8x128xf32>
    %24 = arith.addf %20, %23 : vector<8x128xf32>
    %cst_17 = arith.constant 0.000000e+00 : f32
    %25 = vector.broadcast %cst_17 : f32 to vector<8x128xf32>
    %26 = arith.maximumf %24, %25 : vector<8x128xf32>
    %c0_18 = arith.constant 0 : index
    %c0_19 = arith.constant 0 : index
    %27 = vector.load %arg8[%c0_18, %c0_19] : memref<8x128xf32, #tpu.memory_space<vmem>>, vector<8x128xf32>
    tpu.vector_store %arg8[%c0_18, %c0_19], %26 {strides = array<i32>} : memref<8x128xf32, #tpu.memory_space<vmem>>, vector<8x128xf32>,
    return
  }
  func.func @transform_0(%arg0: i32) -> (i32, i32) {
    %c0_i32 = arith.constant 0 : i32
    %c0_i32_0 = arith.constant 0 : i32
    return %arg0, %c0_i32 : i32, i32
  }
  func.func @transform_1(%arg0: i32) -> (i32, i32) {
    %c0_i32 = arith.constant 0 : i32
    %c0_i32_0 = arith.constant 0 : i32
    %c0_i32_1 = arith.constant 0 : i32
    return %c0_i32, %c0_i32_0 : i32, i32
  }
  func.func @transform_2(%arg0: i32) -> (i32, i32) {
    %c0_i32 = arith.constant 0 : i32
    %c0_i32_0 = arith.constant 0 : i32
    %c0_i32_1 = arith.constant 0 : i32
    return %c0_i32, %c0_i32_0 : i32, i32
  }
  func.func @transform_3(%arg0: i32) -> (i32, i32) {
    %c0_i32 = arith.constant 0 : i32
    %c0_i32_0 = arith.constant 0 : i32
    %c0_i32_1 = arith.constant 0 : i32
    return %c0_i32, %c0_i32_0 : i32, i32
  }
  func.func @transform_4(%arg0: i32) -> (i32, i32) {
    %c0_i32 = arith.constant 0 : i32
    %c0_i32_0 = arith.constant 0 : i32
    %c0_i32_1 = arith.constant 0 : i32
    return %c0_i32, %c0_i32_0 : i32, i32
  }
  func.func @transform_5(%arg0: i32) -> (i32, i32) {
    %c0_i32 = arith.constant 0 : i32
    %c0_i32_0 = arith.constant 0 : i32
    %c0_i32_1 = arith.constant 0 : i32
    return %c0_i32, %c0_i32_0 : i32, i32
  }
  func.func @transform_6(%arg0: i32) -> (i32, i32) {
    %c0_i32 = arith.constant 0 : i32
    %c0_i32_0 = arith.constant 0 : i32
    %c0_i32_1 = arith.constant 0 : i32
    return %c0_i32, %c0_i32_0 : i32, i32
  }
  func.func @transform_7(%arg0: i32) -> (i32, i32) {
    %c0_i32 = arith.constant 0 : i32
    %c0_i32_0 = arith.constant 0 : i32
    return %arg0, %c0_i32 : i32, i32
  }
}

</mosaic_0001>

<bundles_post_ra>
// kernel: tpu_custom_call.1
= control target key start
LH: loop header
LB: loop body
LE: loop exit
PB: predicated region body
PF: predicated region fallthrough
CT: control target
= control target key end

     0   :  { %12 = vsyncpa [#allocation3], 0  ;;  %s895_s0 = inlined_call_operand.hbm [shape: bf16[8,128], index: 0, kind: input, shape index: {}]   ;;  %s896_s1 = inlined_call_operand.hbm [shape: bf16[128,128], index: 1, kind: input, shape index: {}]   ;;  %s897_s2 = inlined_call_operand.hbm [shape: bf16[128,128], index: 2, kind: input, shape index: {}]   ;;  %s898_s3 = inlined_call_operand.hbm [shape: bf16[128,128], index: 3, kind: input, shape index: {}]   ;;  %s899_s4 = inlined_call_operand.vmem [shape: f32[8,128], index: 4, kind: input, shape index: {}]   ;;  %s900_s5 = inlined_call_operand.vmem [shape: f32[8,128], index: 5, kind: input, shape index: {}]   ;;  %s901_s6 = inlined_call_operand.hbm [shape: f32[8,128], index: 6, kind: input, shape index: {}]   ;;  %s902_s7 = inlined_call_operand.hbm [shape: f32[8,128], index: 7, kind: output, shape index: {}]  }
   0x1   :  { %13 = vsyncpa [#allocation6], 0 }
   0x2   :  { %14 = vsyncpa [#allocation9], 0 }
   0x3   :  { %15 = vsyncpa [#allocation4], 0  ;;  %s728_s24 = smov [#allocation5]   ;;  %s588_s28 = scalar_lea.hbm %s896_s1, 1024 }
   0x4   :  { %s31_s25 = sshll.u32 %s728_s24, 4  ;;  %p589_p0 = scmp.ne.s32.totalorder %s896_s1, %s588_s28  ;;  %s32_s25 = int_to_ptr.vmem [resolvable:$true] %s31_s25 }
   0x5   :  { %p592_p1 = scmp.lt.u32.totalorder %s588_s28, %s896_s1 }
   0x7   :  { %p594_p2 = pnand %p592_p1, %p589_p0 }
   0x9   :  { %597 = shalt.err (!%p594_p2)
}
   0xa   :  { %s598_s10 = scalar_lea.vmem %s32_s25, 1024  ;;  %p603_p4 = scmp.lt.s32.totalorder %s32_s25, %s32_s25 }
   0xb   :  { %p599_p3 = scmp.ne.s32.totalorder %s32_s25, %s598_s10  ;;  %p604_p5 = scmp.lt.s32.totalorder %s598_s10, %s598_s10 }
   0xd   :  { %p605_p6 = por %p604_p5, %p603_p4 }
   0xf   :  { %p606_p7 = pnand %p605_p6, %p599_p3 }
  0x11   :  { %609 = shalt.err (!%p606_p7)
}
  0x12   :  { %s729_s11 = smov 64   ;;  %s730_s12 = smov 4  }
  0x13   :  { %37 = dma.hbm_to_vmem [thread:$0]  %s896_s1, 1024, %s32_s25, [#allocation6], %s729_s11, %s729_s11, %s730_s12  }
  0x14   :  { %s731_s15 = smov [#allocation8]   ;;  %s732_s17 = smov [#allocation2]  }
  0x15   :  { %s55_s16 = sshll.u32 %s731_s15, 4  ;;  %s22_s18 = sshll.u32 %s732_s17, 4  ;;  %s56_s16 = int_to_ptr.vmem [resolvable:$true] %s55_s16  ;;  %s23_s18 = int_to_ptr.vmem [resolvable:$true] %s22_s18 }
  0x16   :  { %s610_s21 = scalar_lea.hbm %s898_s3, 1024 }
  0x17   :  { %p611_p8 = scmp.ne.s32.totalorder %s898_s3, %s610_s21  ;;  %p614_p9 = scmp.lt.u32.totalorder %s610_s21, %s898_s3 }
  0x19   :  { %p616_p10 = pnand %p614_p9, %p611_p8 }
  0x1b   :  { %619 = shalt.err (!%p616_p10)
}
  0x1c   :  { %s620_s1 = scalar_lea.vmem %s56_s16, 1024  ;;  %p625_p12 = scmp.lt.s32.totalorder %s56_s16, %s56_s16 }
  0x1d   :  { %p621_p11 = scmp.ne.s32.totalorder %s56_s16, %s620_s1  ;;  %p626_p13 = scmp.lt.s32.totalorder %s620_s1, %s620_s1 }
  0x1f   :  { %p627_p0 = por %p626_p13, %p625_p12 }
  0x21   :  { %p628_p1 = pnand %p627_p0, %p621_p11 }
  0x23   :  { %631 = shalt.err (!%p628_p1)
}
  0x24   :  { %61 = dma.hbm_to_vmem [thread:$0]  %s898_s3, 1024, %s56_s16, [#allocation9], %s729_s11, %s729_s11, %s730_s12  }
  0x25   :  { %s632_s30 = scalar_lea.hbm %s895_s0, 64 }
  0x26   :  { %p633_p2 = scmp.ne.s32.totalorder %s895_s0, %s632_s30  ;;  %p636_p3 = scmp.lt.u32.totalorder %s632_s30, %s895_s0 }
  0x28   :  { %p638_p4 = pnand %p636_p3, %p633_p2 }
  0x2a   :  { %641 = shalt.err (!%p638_p4)
}
  0x2b   :  { %s642_s14 = scalar_lea.vmem %s23_s18, 64  ;;  %p647_p6 = scmp.lt.s32.totalorder %s23_s18, %s23_s18 }
  0x2c   :  { %p643_p5 = scmp.ne.s32.totalorder %s23_s18, %s642_s14  ;;  %p648_p7 = scmp.lt.s32.totalorder %s642_s14, %s642_s14 }
  0x2e   :  { %p649_p8 = por %p648_p7, %p647_p6 }
  0x30   :  { %p650_p9 = pnand %p649_p8, %p643_p5 }
  0x32   :  { %653 = shalt.err (!%p650_p9)
}
  0x33   :  { %25 = dma.hbm_to_vmem [thread:$0]  %s895_s0, 64, %s23_s18, [#allocation3]  }
  0x34   :  { %s733_s16 = smov [#allocation7]   ;;  %s734_s19 = smov [#allocation10]  }
  0x35   :  { %s43_s17 = sshll.u32 %s733_s16, 4  ;;  %s72_s20 = sshll.u32 %s734_s19, 4  ;;  %s44_s17 = int_to_ptr.vmem [resolvable:$true] %s43_s17  ;;  %s73_s20 = int_to_ptr.vmem [resolvable:$true] %s72_s20 }
  0x36   :  { %s654_s23 = scalar_lea.hbm %s897_s2, 1024 }
  0x37   :  { %p655_p10 = scmp.ne.s32.totalorder %s897_s2, %s654_s23  ;;  %p658_p11 = scmp.lt.u32.totalorder %s654_s23, %s897_s2 }
  0x39   :  { %p660_p12 = pnand %p658_p11, %p655_p10 }
  0x3b   :  { %663 = shalt.err (!%p660_p12)
}
  0x3c   :  { %s664_s0 = scalar_lea.vmem %s44_s17, 1024  ;;  %p669_p0 = scmp.lt.s32.totalorder %s44_s17, %s44_s17 }
  0x3d   :  { %p665_p13 = scmp.ne.s32.totalorder %s44_s17, %s664_s0  ;;  %p670_p1 = scmp.lt.s32.totalorder %s664_s0, %s664_s0 }
  0x3f   :  { %p671_p2 = por %p670_p1, %p669_p0 }
  0x41   :  { %p672_p3 = pnand %p671_p2, %p665_p13 }
  0x43   :  { %675 = shalt.err (!%p672_p3)
}
  0x44   :  { %49 = dma.hbm_to_vmem [thread:$0]  %s897_s2, 1024, %s44_s17, [#allocation6], %s729_s11, %s729_s11, %s730_s12  }
  0x45   :  { %s676_s30 = scalar_lea.hbm %s901_s6, 128 }
  0x46   :  { %p677_p4 = scmp.ne.s32.totalorder %s901_s6, %s676_s30  ;;  %p680_p5 = scmp.lt.u32.totalorder %s676_s30, %s901_s6 }
  0x48   :  { %p682_p6 = pnand %p680_p5, %p677_p4 }
  0x4a   :  { %685 = shalt.err (!%p682_p6)
}
  0x4b   :  { %s686_s14 = scalar_lea.vmem %s73_s20, 128  ;;  %p691_p8 = scmp.lt.s32.totalorder %s73_s20, %s73_s20 }
  0x4c   :  { %p687_p7 = scmp.ne.s32.totalorder %s73_s20, %s686_s14  ;;  %p692_p9 = scmp.lt.s32.totalorder %s686_s14, %s686_s14 }
  0x4e   :  { %p693_p10 = por %p692_p9, %p691_p8 }
  0x50   :  { %p694_p11 = pnand %p693_p10, %p687_p7 }
  0x52   :  { %697 = shalt.err (!%p694_p11)
}
  0x53   :  { %75 = dma.hbm_to_vmem [thread:$0]  %s901_s6, 128, %s73_s20, [#allocation9]  }
  0x54   :  { %720 = dma.done.wait [#allocation3], 64  }
  0x55   :  { %721 = vsyncadd [#allocation3], 4294967232 }
  0x56   :  { %722 = dma.done.wait [#allocation6], 2048  }
  0x57   :  { %723 = vsyncadd [#allocation6], 4294965248 }
  0x58   :  { %724 = dma.done.wait [#allocation9], 1152  }
  0x59   :  { %725 = vsyncadd [#allocation9], 4294966144  ;;  %v735_v0 = vmov 0.0   ;;  %vm736_vm0 = vmmov 0   ;;  %v564_v1 = vld [vmem:[#allocation5] sm:$0xff]   ;;  %v565_v2 = vld [vmem:[#allocation5 + $0x8] sm:$0xff]   ;;  %v110_v24 = vlaneseq }
  0x5a   :  { %494 = vmatprep.subr.bf16.mxu0 %v735_v0  ;;  %510 = vmatprep.mubr.msk.bf16.mxu0 %vm736_vm0, %v735_v0  ;;  %v566_v3 = vld [vmem:[#allocation5 + $0x10] sm:$0xff]   ;;  %v572_v4 = vld [vmem:[#allocation7] sm:$0xff]   ;;  %v567_v5 = vld [vmem:[#allocation5 + $0x18] sm:$0xff]  }
  0x5b   :  { %514 = vmatprep.subr.bf16.mxu1 %v735_v0  ;;  %530 = vmatprep.mubr.msk.bf16.mxu1 %vm736_vm0, %v735_v0  ;;  %v573_v6 = vld [vmem:[#allocation7 + $0x8] sm:$0xff]   ;;  %v568_v7 = vld [vmem:[#allocation5 + $0x20] sm:$0xff]   ;;  %v574_v8 = vld [vmem:[#allocation7 + $0x10] sm:$0xff]   ;;  %v111_v25 = vshrl.u32 %v110_v24, 7 }
  0x5c   :  { %495 = vmatpush3.bf16.msra.mxu0 %v564_v1  ;;  %515 = vmatpush3.bf16.msra.mxu1 %v572_v4  ;;  %v569_v9 = vld [vmem:[#allocation5 + $0x28] sm:$0xff]   ;;  %v575_v10 = vld [vmem:[#allocation7 + $0x18] sm:$0xff]   ;;  %v570_v11 = vld [vmem:[#allocation5 + $0x30] sm:$0xff]  }
  0x5d   :  { %496 = vmatprep.subr.bf16.mxu0 %v735_v0  ;;  %516 = vmatprep.subr.bf16.mxu1 %v735_v0  ;;  %v576_v12 = vld [vmem:[#allocation7 + $0x20] sm:$0xff]   ;;  %v571_v13 = vld [vmem:[#allocation5 + $0x38] sm:$0xff]   ;;  %v577_v14 = vld [vmem:[#allocation7 + $0x28] sm:$0xff]   ;;  %v112_v26 = vsub.s32 0, %v111_v25 }
  0x5e   :  { %v92_v15 = vld [vmem:[#allocation2] sm:$0xf]  ;;  %v578_v16 = vld [vmem:[#allocation7 + $0x30] sm:$0xff]   ;;  %v580_v18 = vld [vmem:[#allocation8] sm:$0xff]  }
  0x5f   :  { %v579_v17 = vld [vmem:[#allocation7 + $0x38] sm:$0xff]   ;;  %v581_v19 = vld [vmem:[#allocation8 + $0x8] sm:$0xff]   ;;  %v582_v20 = vld [vmem:[#allocation8 + $0x10] sm:$0xff]  }
  0x60   :  { %497 = vmatpush3.bf16.msra.mxu0 %v565_v2  ;;  %517 = vmatpush3.bf16.msra.mxu1 %v573_v6  ;;  %v583_v21 = vld [vmem:[#allocation8 + $0x18] sm:$0xff]   ;;  %v584_v22 = vld [vmem:[#allocation8 + $0x20] sm:$0xff]   ;;  %v585_v23 = vld [vmem:[#allocation8 + $0x28] sm:$0xff]  }
  0x61   :  { %498 = vmatprep.subr.bf16.mxu0 %v735_v0  ;;  %518 = vmatprep.subr.bf16.mxu1 %v735_v0  ;;  %v109_v27 = vld [vmem:[%s899_s4] sm:$0xff]  ;;  %v587_v37 = vld [vmem:[#allocation8 + $0x38] sm:$0xff]   ;;  %v331_v47 = vld [vmem:[#allocation10] sm:$0xff]  ;;  %s737_s4 = smov [#allocation11]  }
  0x62   :  { %v113_v28 = vrot.slane %v109_v27, %v112_v26  ;;  %v586_v36 = vld [vmem:[#allocation8 + $0x30] sm:$0xff]   ;;  %v335_v48 = vrot.slane %v331_v47, %v112_v26  ;;  %s432_s16 = sshll.u32 %s737_s4, 4  ;;  %s433_s16 = int_to_ptr.vmem [resolvable:$true] %s432_s16 }
  0x63   :  { %v220_v38 = vld [vmem:[%s900_s5] sm:$0xff]  ;;  %s698_s5 = scalar_lea.vmem %s433_s16, 128  ;;  %p703_p13 = scmp.lt.s32.totalorder %s433_s16, %s433_s16 }
  0x64   :  { %499 = vmatpush3.bf16.msra.mxu0 %v566_v3  ;;  %519 = vmatpush3.bf16.msra.mxu1 %v574_v8  ;;  %v224_v39 = vrot.slane %v220_v38, %v112_v26  ;;  %p699_p12 = scmp.ne.s32.totalorder %s433_s16, %s698_s5  ;;  %p704_p0 = scmp.lt.s32.totalorder %s698_s5, %s698_s5 }
  0x65   :  { %500 = vmatprep.subr.bf16.mxu0 %v735_v0  ;;  %520 = vmatprep.subr.bf16.mxu1 %v735_v0 }
  0x66   :  { %p705_p1 = por %p704_p0, %p703_p13 }
  0x68   :  { %501 = vmatpush3.bf16.msra.mxu0 %v567_v5  ;;  %521 = vmatpush3.bf16.msra.mxu1 %v575_v10  ;;  %p706_p2 = pnand %p705_p1, %p699_p12 }
  0x69   :  { %502 = vmatprep.subr.bf16.mxu0 %v735_v0  ;;  %522 = vmatprep.subr.bf16.mxu1 %v735_v0 }
  0x6c   :  { %503 = vmatpush3.bf16.msra.mxu0 %v568_v7  ;;  %523 = vmatpush3.bf16.msra.mxu1 %v576_v12 }
  0x6d   :  { %504 = vmatprep.subr.bf16.mxu0 %v735_v0  ;;  %524 = vmatprep.subr.bf16.mxu1 %v735_v0 }
  0x70   :  { %505 = vmatpush3.bf16.msra.mxu0 %v569_v9  ;;  %525 = vmatpush3.bf16.msra.mxu1 %v577_v14 }
  0x71   :  { %506 = vmatprep.subr.bf16.mxu0 %v735_v0  ;;  %526 = vmatprep.subr.bf16.mxu1 %v735_v0 }
  0x74   :  { %507 = vmatpush3.bf16.msra.mxu0 %v570_v11  ;;  %527 = vmatpush3.bf16.msra.mxu1 %v578_v16 }
  0x75   :  { %508 = vmatprep.subr.bf16.mxu0 %v735_v0  ;;  %528 = vmatprep.subr.bf16.mxu1 %v735_v0 }
  0x78   :  { %509 = vmatpush3.bf16.msra.mxu0 %v571_v13  ;;  %529 = vmatpush3.bf16.msra.mxu1 %v579_v17 }
  0x79   :  { %534 = vmatprep.subr.bf16.mxu0 %v735_v0 }
  0x7b   :  { %511 = vmatmul.mubr.bf16.vlgmr.msra.gmra.mrb[0].mxu0 %v92_v15 }
  0x7c   :  { %550 = vmatprep.mubr.msk.bf16.mxu0 %vm736_vm0, %v735_v0  ;;  %535 = vmatpush3.bf16.msra.mxu0 %v580_v18 }
  0x7d   :  { %536 = vmatprep.subr.bf16.mxu0 %v735_v0 }
  0x80   :  { %537 = vmatpush3.bf16.msra.mxu0 %v581_v19 }
  0x81   :  { %538 = vmatprep.subr.bf16.mxu0 %v735_v0 }
  0x84   :  { %539 = vmatpush3.bf16.msra.mxu0 %v582_v20 }
  0x85   :  { %540 = vmatprep.subr.bf16.mxu0 %v735_v0 }
  0x88   :  { %541 = vmatpush3.bf16.msra.mxu0 %v583_v21 }
  0x89   :  { %542 = vmatprep.subr.bf16.mxu0 %v735_v0 }
  0x8c   :  { %543 = vmatpush3.bf16.msra.mxu0 %v584_v22 }
  0x8d   :  { %544 = vmatprep.subr.bf16.mxu0 %v735_v0 }
  0x90   :  { %545 = vmatpush3.bf16.msra.mxu0 %v585_v23 }
  0x91   :  { %546 = vmatprep.subr.bf16.mxu0 %v735_v0 }
  0x94   :  { %547 = vmatpush3.bf16.msra.mxu0 %v586_v36 }
  0x95   :  { %548 = vmatprep.subr.bf16.mxu0 %v735_v0 }
  0x98   :  { %549 = vmatpush3.bf16.msra.mxu0 %v587_v37 }
 0x14e   :  { %v196_v29 = vpop.f32.mrb[0].mxu0 }
 0x14f   :  { %v197_v30 = vadd.f32 %v196_v29, %v113_v28  ;;  %v512_v31 = vpop.f32.mrb[1].mxu0 }
 0x150   :  { %v199_v32 = vpop.f32.mrb[2].mxu0 }
 0x151   :  { %v202_v33 = vmax.f32 %v197_v30, 0.0  ;;  %v513_v34 = vpop.f32.mrb[3].mxu0 }
 0x153   :  { %v203_v35 = vpack.c.bf16 %v202_v33, %v202_v33 }
 0x155   :  { %531 = vmatmul.mubr.bf16.vlgmr.msra.gmra.mrb[0].mxu1 %v203_v35 }
 0x228   :  { %v307_v40 = vpop.f32.mrb[0].mxu1 }
 0x229   :  { %v308_v41 = vadd.f32 %v307_v40, %v224_v39  ;;  %v532_v42 = vpop.f32.mrb[1].mxu1 }
 0x22a   :  { %v310_v43 = vpop.f32.mrb[2].mxu1 }
 0x22b   :  { %v313_v44 = vmax.f32 %v308_v41, 0.0  ;;  %v533_v45 = vpop.f32.mrb[3].mxu1 }
 0x22d   :  { %v314_v46 = vpack.c.bf16 %v313_v44, %v313_v44 }
 0x22f   :  { %551 = vmatmul.mubr.bf16.vlgmr.msra.gmra.mrb[4].mxu0 %v314_v46 }
 0x302   :  { %v418_v49 = vpop.f32.mrb[4].mxu0 }
 0x303   :  { %v419_v50 = vadd.f32 %v418_v49, %v335_v48  ;;  %v552_v51 = vpop.f32.mrb[5].mxu0 }
 0x304   :  { %v421_v52 = vpop.f32.mrb[6].mxu0 }
 0x305   :  { %v424_v53 = vmax.f32 %v419_v50, 0.0  ;;  %v553_v54 = vpop.f32.mrb[7].mxu0 }
 0x307   :  { %425 = vst [vmem:[#allocation11] sm:$0xff] %v424_v53 }
 0x308   :  { %709 = shalt.err (!%p706_p2)
}
 0x309   :  { %s710_s20 = scalar_lea.hbm %s902_s7, 128 }
 0x30a   :  { %p711_p3 = scmp.ne.s32.totalorder %s902_s7, %s710_s20  ;;  %p714_p4 = scmp.lt.u32.totalorder %s710_s20, %s902_s7 }
 0x30c   :  { %p716_p5 = pnand %p714_p4, %p711_p3 }
 0x30e   :  { %719 = shalt.err (!%p716_p5)
}
 0x30f   :  { %435 = dma.vmem_to_hbm [thread:$0]  %s433_s16, 128, %s902_s7, [#allocation4]  }
 0x310   :  { %726 = dma.done.wait [#allocation4], 128  }
 0x311   :  { %727 = vsyncadd [#allocation4], 4294967168 }
 0x312   :  { %439 = vsyncpa [#allocation3], 1 }
 0x313   :  { %440 = vsyncpa [#allocation6], 1 }
 0x314   :  { %441 = vsyncpa [#allocation9], 1 }
 0x315   :  { %442 = vsyncpa [#allocation4], 1 }

// kernel: tpu_custom_call.1
= control target key start
LH: loop header
LB: loop body
LE: loop exit
PB: predicated region body
PF: predicated region fallthrough
CT: control target
= control target key end

     0   :  { %12 = vsyncpa [#allocation3], 0  ;;  %s895_s0 = inlined_call_operand.hbm [shape: bf16[8,128], index: 0, kind: input, shape index: {}]   ;;  %s896_s1 = inlined_call_operand.hbm [shape: bf16[128,128], index: 1, kind: input, shape index: {}]   ;;  %s897_s2 = inlined_call_operand.hbm [shape: bf16[128,128], index: 2, kind: input, shape index: {}]   ;;  %s898_s3 = inlined_call_operand.hbm [shape: bf16[128,128], index: 3, kind: input, shape index: {}]   ;;  %s899_s4 = inlined_call_operand.vmem [shape: f32[8,128], index: 4, kind: input, shape index: {}]   ;;  %s900_s5 = inlined_call_operand.vmem [shape: f32[8,128], index: 5, kind: input, shape index: {}]   ;;  %s901_s6 = inlined_call_operand.hbm [shape: f32[8,128], index: 6, kind: input, shape index: {}]   ;;  %s902_s7 = inlined_call_operand.hbm [shape: f32[8,128], index: 7, kind: output, shape index: {}]  }
   0x1   :  { %13 = vsyncpa [#allocation6], 0 }
   0x2   :  { %14 = vsyncpa [#allocation9], 0 }
   0x3   :  { %15 = vsyncpa [#allocation4], 0  ;;  %s728_s24 = smov [#allocation5]   ;;  %s588_s28 = scalar_lea.hbm %s896_s1, 1024 }
   0x4   :  { %s31_s25 = sshll.u32 %s728_s24, 4  ;;  %p589_p0 = scmp.ne.s32.totalorder %s896_s1, %s588_s28  ;;  %s32_s25 = int_to_ptr.vmem [resolvable:$true] %s31_s25 }
   0x5   :  { %p592_p1 = scmp.lt.u32.totalorder %s588_s28, %s896_s1 }
   0x7   :  { %p594_p2 = pnand %p592_p1, %p589_p0 }
   0x9   :  { %597 = shalt.err (!%p594_p2)
}
   0xa   :  { %s598_s10 = scalar_lea.vmem %s32_s25, 1024  ;;  %p603_p4 = scmp.lt.s32.totalorder %s32_s25, %s32_s25 }
   0xb   :  { %p599_p3 = scmp.ne.s32.totalorder %s32_s25, %s598_s10  ;;  %p604_p5 = scmp.lt.s32.totalorder %s598_s10, %s598_s10 }
   0xd   :  { %p605_p6 = por %p604_p5, %p603_p4 }
   0xf   :  { %p606_p7 = pnand %p605_p6, %p599_p3 }
  0x11   :  { %609 = shalt.err (!%p606_p7)
}
  0x12   :  { %s729_s11 = smov 64   ;;  %s730_s12 = smov 4  }
  0x13   :  { %37 = dma.hbm_to_vmem [thread:$0]  %s896_s1, 1024, %s32_s25, [#allocation6], %s729_s11, %s729_s11, %s730_s12  }
  0x14   :  { %s731_s15 = smov [#allocation8]   ;;  %s732_s17 = smov [#allocation2]  }
  0x15   :  { %s55_s16 = sshll.u32 %s731_s15, 4  ;;  %s22_s18 = sshll.u32 %s732_s17, 4  ;;  %s56_s16 = int_to_ptr.vmem [resolvable:$true] %s55_s16  ;;  %s23_s18 = int_to_ptr.vmem [resolvable:$true] %s22_s18 }
  0x16   :  { %s610_s21 = scalar_lea.hbm %s898_s3, 1024 }
  0x17   :  { %p611_p8 = scmp.ne.s32.totalorder %s898_s3, %s610_s21  ;;  %p614_p9 = scmp.lt.u32.totalorder %s610_s21, %s898_s3 }
  0x19   :  { %p616_p10 = pnand %p614_p9, %p611_p8 }
  0x1b   :  { %619 = shalt.err (!%p616_p10)
}
  0x1c   :  { %s620_s1 = scalar_lea.vmem %s56_s16, 1024  ;;  %p625_p12 = scmp.lt.s32.totalorder %s56_s16, %s56_s16 }
  0x1d   :  { %p621_p11 = scmp.ne.s32.totalorder %s56_s16, %s620_s1  ;;  %p626_p13 = scmp.lt.s32.totalorder %s620_s1, %s620_s1 }
  0x1f   :  { %p627_p0 = por %p626_p13, %p625_p12 }
  0x21   :  { %p628_p1 = pnand %p627_p0, %p621_p11 }
  0x23   :  { %631 = shalt.err (!%p628_p1)
}
  0x24   :  { %61 = dma.hbm_to_vmem [thread:$0]  %s898_s3, 1024, %s56_s16, [#allocation9], %s729_s11, %s729_s11, %s730_s12  }
  0x25   :  { %s632_s30 = scalar_lea.hbm %s895_s0, 64 }
  0x26   :  { %p633_p2 = scmp.ne.s32.totalorder %s895_s0, %s632_s30  ;;  %p636_p3 = scmp.lt.u32.totalorder %s632_s30, %s895_s0 }
  0x28   :  { %p638_p4 = pnand %p636_p3, %p633_p2 }
  0x2a   :  { %641 = shalt.err (!%p638_p4)
}
  0x2b   :  { %s642_s14 = scalar_lea.vmem %s23_s18, 64  ;;  %p647_p6 = scmp.lt.s32.totalorder %s23_s18, %s23_s18 }
  0x2c   :  { %p643_p5 = scmp.ne.s32.totalorder %s23_s18, %s642_s14  ;;  %p648_p7 = scmp.lt.s32.totalorder %s642_s14, %s642_s14 }
  0x2e   :  { %p649_p8 = por %p648_p7, %p647_p6 }
  0x30   :  { %p650_p9 = pnand %p649_p8, %p643_p5 }
  0x32   :  { %653 = shalt.err (!%p650_p9)
}
  0x33   :  { %25 = dma.hbm_to_vmem [thread:$0]  %s895_s0, 64, %s23_s18, [#allocation3]  }
  0x34   :  { %s733_s16 = smov [#allocation7]   ;;  %s734_s19 = smov [#allocation10]  }
  0x35   :  { %s43_s17 = sshll.u32 %s733_s16, 4  ;;  %s72_s20 = sshll.u32 %s734_s19, 4  ;;  %s44_s17 = int_to_ptr.vmem [resolvable:$true] %s43_s17  ;;  %s73_s20 = int_to_ptr.vmem [resolvable:$true] %s72_s20 }
  0x36   :  { %s654_s23 = scalar_lea.hbm %s897_s2, 1024 }
  0x37   :  { %p655_p10 = scmp.ne.s32.totalorder %s897_s2, %s654_s23  ;;  %p658_p11 = scmp.lt.u32.totalorder %s654_s23, %s897_s2 }
  0x39   :  { %p660_p12 = pnand %p658_p11, %p655_p10 }
  0x3b   :  { %663 = shalt.err (!%p660_p12)
}
  0x3c   :  { %s664_s0 = scalar_lea.vmem %s44_s17, 1024  ;;  %p669_p0 = scmp.lt.s32.totalorder %s44_s17, %s44_s17 }
  0x3d   :  { %p665_p13 = scmp.ne.s32.totalorder %s44_s17, %s664_s0  ;;  %p670_p1 = scmp.lt.s32.totalorder %s664_s0, %s664_s0 }
  0x3f   :  { %p671_p2 = por %p670_p1, %p669_p0 }
  0x41   :  { %p672_p3 = pnand %p671_p2, %p665_p13 }
  0x43   :  { %675 = shalt.err (!%p672_p3)
}
  0x44   :  { %49 = dma.hbm_to_vmem [thread:$0]  %s897_s2, 1024, %s44_s17, [#allocation6], %s729_s11, %s729_s11, %s730_s12  }
  0x45   :  { %s676_s30 = scalar_lea.hbm %s901_s6, 128 }
  0x46   :  { %p677_p4 = scmp.ne.s32.totalorder %s901_s6, %s676_s30  ;;  %p680_p5 = scmp.lt.u32.totalorder %s676_s30, %s901_s6 }
  0x48   :  { %p682_p6 = pnand %p680_p5, %p677_p4 }
  0x4a   :  { %685 = shalt.err (!%p682_p6)
}
  0x4b   :  { %s686_s14 = scalar_lea.vmem %s73_s20, 128  ;;  %p691_p8 = scmp.lt.s32.totalorder %s73_s20, %s73_s20 }
  0x4c   :  { %p687_p7 = scmp.ne.s32.totalorder %s73_s20, %s686_s14  ;;  %p692_p9 = scmp.lt.s32.totalorder %s686_s14, %s686_s14 }
  0x4e   :  { %p693_p10 = por %p692_p9, %p691_p8 }
  0x50   :  { %p694_p11 = pnand %p693_p10, %p687_p7 }
  0x52   :  { %697 = shalt.err (!%p694_p11)
}
  0x53   :  { %75 = dma.hbm_to_vmem [thread:$0]  %s901_s6, 128, %s73_s20, [#allocation9]  }
  0x54   :  { %720 = dma.done.wait [#allocation3], 64  }
  0x55   :  { %721 = vsyncadd [#allocation3], 4294967232 }
  0x56   :  { %722 = dma.done.wait [#allocation6], 2048  }
  0x57   :  { %723 = vsyncadd [#allocation6], 4294965248 }
  0x58   :  { %724 = dma.done.wait [#allocation9], 1152  }
  0x59   :  { %725 = vsyncadd [#allocation9], 4294966144  ;;  %v735_v0 = vmov 0.0   ;;  %vm736_vm0 = vmmov 0   ;;  %v564_v1 = vld [vmem:[#allocation5] sm:$0xff]   ;;  %v565_v2 = vld [vmem:[#allocation5 + $0x8] sm:$0xff]   ;;  %v110_v24 = vlaneseq }
  0x5a   :  { %494 = vmatprep.subr.bf16.mxu0 %v735_v0  ;;  %510 = vmatprep.mubr.msk.bf16.mxu0 %vm736_vm0, %v735_v0  ;;  %v566_v3 = vld [vmem:[#allocation5 + $0x10] sm:$0xff]   ;;  %v572_v4 = vld [vmem:[#allocation7] sm:$0xff]   ;;  %v567_v5 = vld [vmem:[#allocation5 + $0x18] sm:$0xff]  }
  0x5b   :  { %514 = vmatprep.subr.bf16.mxu1 %v735_v0  ;;  %530 = vmatprep.mubr.msk.bf16.mxu1 %vm736_vm0, %v735_v0  ;;  %v573_v6 = vld [vmem:[#allocation7 + $0x8] sm:$0xff]   ;;  %v568_v7 = vld [vmem:[#allocation5 + $0x20] sm:$0xff]   ;;  %v574_v8 = vld [vmem:[#allocation7 + $0x10] sm:$0xff]   ;;  %v111_v25 = vshrl.u32 %v110_v24, 7 }
  0x5c   :  { %495 = vmatpush3.bf16.msra.mxu0 %v564_v1  ;;  %515 = vmatpush3.bf16.msra.mxu1 %v572_v4  ;;  %v569_v9 = vld [vmem:[#allocation5 + $0x28] sm:$0xff]   ;;  %v575_v10 = vld [vmem:[#allocation7 + $0x18] sm:$0xff]   ;;  %v570_v11 = vld [vmem:[#allocation5 + $0x30] sm:$0xff]  }
  0x5d   :  { %496 = vmatprep.subr.bf16.mxu0 %v735_v0  ;;  %516 = vmatprep.subr.bf16.mxu1 %v735_v0  ;;  %v576_v12 = vld [vmem:[#allocation7 + $0x20] sm:$0xff]   ;;  %v571_v13 = vld [vmem:[#allocation5 + $0x38] sm:$0xff]   ;;  %v577_v14 = vld [vmem:[#allocation7 + $0x28] sm:$0xff]   ;;  %v112_v26 = vsub.s32 0, %v111_v25 }
  0x5e   :  { %v92_v15 = vld [vmem:[#allocation2] sm:$0xf]  ;;  %v578_v16 = vld [vmem:[#allocation7 + $0x30] sm:$0xff]   ;;  %v580_v18 = vld [vmem:[#allocation8] sm:$0xff]  }
  0x5f   :  { %v579_v17 = vld [vmem:[#allocation7 + $0x38] sm:$0xff]   ;;  %v581_v19 = vld [vmem:[#allocation8 + $0x8] sm:$0xff]   ;;  %v582_v20 = vld [vmem:[#allocation8 + $0x10] sm:$0xff]  }
  0x60   :  { %497 = vmatpush3.bf16.msra.mxu0 %v565_v2  ;;  %517 = vmatpush3.bf16.msra.mxu1 %v573_v6  ;;  %v583_v21 = vld [vmem:[#allocation8 + $0x18] sm:$0xff]   ;;  %v584_v22 = vld [vmem:[#allocation8 + $0x20] sm:$0xff]   ;;  %v585_v23 = vld [vmem:[#allocation8 + $0x28] sm:$0xff]  }
  0x61   :  { %498 = vmatprep.subr.bf16.mxu0 %v735_v0  ;;  %518 = vmatprep.subr.bf16.mxu1 %v735_v0  ;;  %v109_v27 = vld [vmem:[%s899_s4] sm:$0xff]  ;;  %v587_v37 = vld [vmem:[#allocation8 + $0x38] sm:$0xff]   ;;  %v331_v47 = vld [vmem:[#allocation10] sm:$0xff]  ;;  %s737_s4 = smov [#allocation11]  }
  0x62   :  { %v113_v28 = vrot.slane %v109_v27, %v112_v26  ;;  %v586_v36 = vld [vmem:[#allocation8 + $0x30] sm:$0xff]   ;;  %v335_v48 = vrot.slane %v331_v47, %v112_v26  ;;  %s432_s16 = sshll.u32 %s737_s4, 4  ;;  %s433_s16 = int_to_ptr.vmem [resolvable:$true] %s432_s16 }
  0x63   :  { %v220_v38 = vld [vmem:[%s900_s5] sm:$0xff]  ;;  %s698_s5 = scalar_lea.vmem %s433_s16, 128  ;;  %p703_p13 = scmp.lt.s32.totalorder %s433_s16, %s433_s16 }
  0x64   :  { %499 = vmatpush3.bf16.msra.mxu0 %v566_v3  ;;  %519 = vmatpush3.bf16.msra.mxu1 %v574_v8  ;;  %v224_v39 = vrot.slane %v220_v38, %v112_v26  ;;  %p699_p12 = scmp.ne.s32.totalorder %s433_s16, %s698_s5  ;;  %p704_p0 = scmp.lt.s32.totalorder %s698_s5, %s698_s5 }
  0x65   :  { %500 = vmatprep.subr.bf16.mxu0 %v735_v0  ;;  %520 = vmatprep.subr.bf16.mxu1 %v735_v0 }
  0x66   :  { %p705_p1 = por %p704_p0, %p703_p13 }
  0x68   :  { %501 = vmatpush3.bf16.msra.mxu0 %v567_v5  ;;  %521 = vmatpush3.bf16.msra.mxu1 %v575_v10  ;;  %p706_p2 = pnand %p705_p1, %p699_p12 }
  0x69   :  { %502 = vmatprep.subr.bf16.mxu0 %v735_v0  ;;  %522 = vmatprep.subr.bf16.mxu1 %v735_v0 }
  0x6c   :  { %503 = vmatpush3.bf16.msra.mxu0 %v568_v7  ;;  %523 = vmatpush3.bf16.msra.mxu1 %v576_v12 }
  0x6d   :  { %504 = vmatprep.subr.bf16.mxu0 %v735_v0  ;;  %524 = vmatprep.subr.bf16.mxu1 %v735_v0 }
  0x70   :  { %505 = vmatpush3.bf16.msra.mxu0 %v569_v9  ;;  %525 = vmatpush3.bf16.msra.mxu1 %v577_v14 }
  0x71   :  { %506 = vmatprep.subr.bf16.mxu0 %v735_v0  ;;  %526 = vmatprep.subr.bf16.mxu1 %v735_v0 }
  0x74   :  { %507 = vmatpush3.bf16.msra.mxu0 %v570_v11  ;;  %527 = vmatpush3.bf16.msra.mxu1 %v578_v16 }
  0x75   :  { %508 = vmatprep.subr.bf16.mxu0 %v735_v0  ;;  %528 = vmatprep.subr.bf16.mxu1 %v735_v0 }
  0x78   :  { %509 = vmatpush3.bf16.msra.mxu0 %v571_v13  ;;  %529 = vmatpush3.bf16.msra.mxu1 %v579_v17 }
  0x79   :  { %534 = vmatprep.subr.bf16.mxu0 %v735_v0 }
  0x7b   :  { %511 = vmatmul.mubr.bf16.vlgmr.msra.gmra.mrb[0].mxu0 %v92_v15 }
  0x7c   :  { %550 = vmatprep.mubr.msk.bf16.mxu0 %vm736_vm0, %v735_v0  ;;  %535 = vmatpush3.bf16.msra.mxu0 %v580_v18 }
  0x7d   :  { %536 = vmatprep.subr.bf16.mxu0 %v735_v0 }
  0x80   :  { %537 = vmatpush3.bf16.msra.mxu0 %v581_v19 }
  0x81   :  { %538 = vmatprep.subr.bf16.mxu0 %v735_v0 }
  0x84   :  { %539 = vmatpush3.bf16.msra.mxu0 %v582_v20 }
  0x85   :  { %540 = vmatprep.subr.bf16.mxu0 %v735_v0 }
  0x88   :  { %541 = vmatpush3.bf16.msra.mxu0 %v583_v21 }
  0x89   :  { %542 = vmatprep.subr.bf16.mxu0 %v735_v0 }
  0x8c   :  { %543 = vmatpush3.bf16.msra.mxu0 %v584_v22 }
  0x8d   :  { %544 = vmatprep.subr.bf16.mxu0 %v735_v0 }
  0x90   :  { %545 = vmatpush3.bf16.msra.mxu0 %v585_v23 }
  0x91   :  { %546 = vmatprep.subr.bf16.mxu0 %v735_v0 }
  0x94   :  { %547 = vmatpush3.bf16.msra.mxu0 %v586_v36 }
  0x95   :  { %548 = vmatprep.subr.bf16.mxu0 %v735_v0 }
  0x98   :  { %549 = vmatpush3.bf16.msra.mxu0 %v587_v37 }
 0x14e   :  { %v196_v29 = vpop.f32.mrb[0].mxu0 }
 0x14f   :  { %v197_v30 = vadd.f32 %v196_v29, %v113_v28  ;;  %v512_v31 = vpop.f32.mrb[1].mxu0 }
 0x150   :  { %v199_v32 = vpop.f32.mrb[2].mxu0 }
 0x151   :  { %v202_v33 = vmax.f32 %v197_v30, 0.0  ;;  %v513_v34 = vpop.f32.mrb[3].mxu0 }
 0x153   :  { %v203_v35 = vpack.c.bf16 %v202_v33, %v202_v33 }
 0x155   :  { %531 = vmatmul.mubr.bf16.vlgmr.msra.gmra.mrb[0].mxu1 %v203_v35 }
 0x228   :  { %v307_v40 = vpop.f32.mrb[0].mxu1 }
 0x229   :  { %v308_v41 = vadd.f32 %v307_v40, %v224_v39  ;;  %v532_v42 = vpop.f32.mrb[1].mxu1 }
 0x22a   :  { %v310_v43 = vpop.f32.mrb[2].mxu1 }
 0x22b   :  { %v313_v44 = vmax.f32 %v308_v41, 0.0  ;;  %v533_v45 = vpop.f32.mrb[3].mxu1 }
 0x22d   :  { %v314_v46 = vpack.c.bf16 %v313_v44, %v313_v44 }
 0x22f   :  { %551 = vmatmul.mubr.bf16.vlgmr.msra.gmra.mrb[4].mxu0 %v314_v46 }
 0x302   :  { %v418_v49 = vpop.f32.mrb[4].mxu0 }
 0x303   :  { %v419_v50 = vadd.f32 %v418_v49, %v335_v48  ;;  %v552_v51 = vpop.f32.mrb[5].mxu0 }
 0x304   :  { %v421_v52 = vpop.f32.mrb[6].mxu0 }
 0x305   :  { %v424_v53 = vmax.f32 %v419_v50, 0.0  ;;  %v553_v54 = vpop.f32.mrb[7].mxu0 }
 0x307   :  { %425 = vst [vmem:[#allocation11] sm:$0xff] %v424_v53 }
 0x308   :  { %709 = shalt.err (!%p706_p2)
}
 0x309   :  { %s710_s20 = scalar_lea.hbm %s902_s7, 128 }
 0x30a   :  { %p711_p3 = scmp.ne.s32.totalorder %s902_s7, %s710_s20  ;;  %p714_p4 = scmp.lt.u32.totalorder %s710_s20, %s902_s7 }
 0x30c   :  { %p716_p5 = pnand %p714_p4, %p711_p3 }
 0x30e   :  { %719 = shalt.err (!%p716_p5)
}
 0x30f   :  { %435 = dma.vmem_to_hbm [thread:$0]  %s433_s16, 128, %s902_s7, [#allocation4]  }
 0x310   :  { %726 = dma.done.wait [#allocation4], 128  }
 0x311   :  { %727 = vsyncadd [#allocation4], 4294967168 }
 0x312   :  { %439 = vsyncpa [#allocation3], 1 }
 0x313   :  { %440 = vsyncpa [#allocation6], 1 }
 0x314   :  { %441 = vsyncpa [#allocation9], 1 }
 0x315   :  { %442 = vsyncpa [#allocation4], 1 }

</bundles_post_ra>
